<compile_context>
chip_gen: v6e
topology: v6e:2x2x1
jax: 0.10.0
libtpu: 0.0.40
codegen_flags: <defaults>
</compile_context>

<pallas_src>
import functools
import numpy as np
import jax
import jax.numpy as jnp
from jax.experimental import pallas as pl
from jax.experimental.pallas import tpu as pltpu


# --------------------------------------------------------------------------------------
# Fused GRU-D cell kernel (one batch tile per grid step)
# --------------------------------------------------------------------------------------
def _gru_d_kernel(x_ref, m_ref, h_ref, g_ref,
                  w_ref, v_ref, urz_ref, uh_ref, b_ref,
                  out_ref):
    f32 = jnp.float32
    H = out_ref.shape[1]
    mxu_dt = w_ref.dtype                       # f32 or bf16 (MXU operand dtype)

    h = g_ref[...] * h_ref[...]                # gamma_h * h, kept in f32
    h_mx = h.astype(mxu_dt)

    # Fused pre-activations: one [TB, 3H] slab from the inputs, one [TB, 2H] from h.
    pre = (jnp.dot(x_ref[...], w_ref[...], preferred_element_type=f32)
           + jnp.dot(m_ref[...], v_ref[...], preferred_element_type=f32)
           + b_ref[...])                                           # [TB, 3H]
    h_pre = jnp.dot(h_mx, urz_ref[...], preferred_element_type=f32)  # [TB, 2H]

    r = jax.nn.sigmoid(pre[:, :H] + h_pre[:, :H])
    z = jax.nn.sigmoid(pre[:, H:2 * H] + h_pre[:, H:])

    h_tilde = jnp.tanh(pre[:, 2 * H:]
                       + jnp.dot((r * h).astype(mxu_dt), uh_ref[...],
                                 preferred_element_type=f32))

    # (1 - z) * h + z * h_tilde  ==  h + z * (h_tilde - h)   (one fewer VPU op)
    out_ref[...] = h + z * (h_tilde - h)


# --------------------------------------------------------------------------------------
# Helpers
# --------------------------------------------------------------------------------------
@functools.lru_cache(maxsize=None)
def _single_buffer_supported():
    """True if this Pallas build accepts pipeline_mode=pl.Buffered(1) on a top-level
    BlockSpec (lets replicated weights be single-buffered in VMEM)."""
    try:
        def _copy(x_ref, o_ref):
            o_ref[...] = x_ref[...]
        probe = pl.pallas_call(
            _copy,
            out_shape=jax.ShapeDtypeStruct((16, 128), jnp.float32),
            grid=(2,),
            in_specs=[pl.BlockSpec((8, 128), lambda i: (0, 0),
                                   pipeline_mode=pl.Buffered(1))],
            out_specs=pl.BlockSpec((8, 128), lambda i: (i, 0)),
        )
        jax.jit(probe).lower(jnp.zeros((8, 128), jnp.float32)).compile()
        return True
    except Exception:
        return False


def _choose_batch_tile(B, block_b):
    """Batch tile: multiple of 8, as large as block_b allows, but with >= 2 grid steps
    when B allows (so both v7x TensorCores get work via the 'parallel' grid axis)."""
    if B <= 8:
        return B                                   # equals full dim -> legal block
    tb = max(8, (min(block_b, B) // 8) * 8)
    if pl.cdiv(B, tb) < 2:
        tb = max(8, ((B + 1) // 2 + 7) // 8 * 8)
    return tb


# --------------------------------------------------------------------------------------
# Wrapper
# --------------------------------------------------------------------------------------
def gru_d_cell_forward(h, X_hat, M_obs, gamma_h, params, *,
                       block_b=256, mxu_dtype=jnp.float32):
    """Fused GRU-D cell forward.

    params: host-fused weights (see init_params).
    block_b: batch tile upper bound (sweep 128/256/512 for production shapes).
    mxu_dtype: dtype for MXU operands (jnp.bfloat16 recommended on v6e/v7x); the
               decay, gate nonlinearities and blend always run in float32.
    """
    B, H = h.shape
    I = X_hat.shape[1]
    f32 = jnp.float32

    h_in = h.astype(f32)
    gamma = jnp.broadcast_to(gamma_h, (B, H)).astype(f32)
    x = X_hat.astype(mxu_dtype)
    m = M_obs.astype(mxu_dtype)

    w = params["w"].astype(mxu_dtype)      # (I, 3H)   [W_r|W_z|W_h]
    v = params["v"].astype(mxu_dtype)      # (I, 3H)   [V_r|V_z|V_h]
    urz = params["urz"].astype(mxu_dtype)  # (H, 2H)   [U_r|U_z]
    uh = params["uh"].astype(mxu_dtype)    # (H, H)
    b = params["b"].astype(f32)            # (1, 3H)   [b_r|b_z|b_h]

    TB = _choose_batch_tile(B, block_b)
    grid = (pl.cdiv(B, TB),)

    def row(width):                               # batch-tiled operand
        return pl.BlockSpec((TB, width), lambda i: (i, 0))

    if _single_buffer_supported():
        def rep(r, c):                            # replicated, single-buffered
            return pl.BlockSpec((r, c), lambda i: (0, 0),
                                pipeline_mode=pl.Buffered(1))
        weight_bufs = 1
    else:
        def rep(r, c):                            # replicated (default buffering)
            return pl.BlockSpec((r, c), lambda i: (0, 0))
        weight_bufs = 2

    # VMEM budget: resident weights (x buffers) + double-buffered batch tiles, with
    # generous headroom, clamped to be valid on all generations (v7x: 64 MiB physical).
    itemsz = jnp.dtype(mxu_dtype).itemsize
    weight_bytes = (2 * I * 3 * H + H * 2 * H + H * H) * itemsz + 3 * H * 4
    tile_bytes = TB * (2 * I * itemsz + 2 * H * 4) + TB * H * 4
    est = weight_bufs * weight_bytes + 2 * tile_bytes
    vmem_limit = int(min(max(2 * est + (8 << 20), 32 << 20), 64 << 20))

    cost = pl.CostEstimate(
        flops=int(2 * B * (2 * I * 3 * H + 3 * H * H) + 12 * B * H),
        transcendentals=int(3 * B * H),
        bytes_accessed=int(B * (2 * I * itemsz + 2 * H * 4)     # x, m, h, gamma
                           + weight_bytes                       # weights + bias
                           + B * H * 4),                        # output
    )

    out = pl.pallas_call(
        _gru_d_kernel,
        out_shape=jax.ShapeDtypeStruct((B, H), f32),
        grid=grid,
        in_specs=[
            row(I), row(I), row(H), row(H),                   # X_hat, M_obs, h, gamma
            rep(I, 3 * H), rep(I, 3 * H),                     # W, V slabs
            rep(H, 2 * H), rep(H, H),                         # U_rz, U_h
            rep(1, 3 * H),                                    # fused bias
        ],
        out_specs=row(H),
        input_output_aliases={2: 0},                          # h buffer -> output
        compiler_params=pltpu.CompilerParams(
            dimension_semantics=("parallel",),
            vmem_limit_bytes=vmem_limit),
        cost_estimate=cost,
    )(x, m, h_in, gamma, w, v, urz, uh, b)

    return out.astype(h.dtype)


# --------------------------------------------------------------------------------------
# Parameter init (matches the PyTorch module: uniform(-1/sqrt(H), 1/sqrt(H)))
# --------------------------------------------------------------------------------------
def init_params(key, input_size, hidden_size):
    ks = jax.random.split(key, 12)
    stdv = 1.0 / np.sqrt(hidden_size)
    u = lambda k, shape: jax.random.uniform(k, shape, jnp.float32, -stdv, stdv)

    raw = {
        "W_r": u(ks[0], (input_size, hidden_size)),
        "V_r": u(ks[1], (input_size, hidden_size)),
        "U_r": u(ks[2], (hidden_size, hidden_size)),
        "W_z": u(ks[3], (input_size, hidden_size)),
        "V_z": u(ks[4], (input_size, hidden_size)),
        "U_z": u(ks[5], (hidden_size, hidden_size)),
        "W_h": u(ks[6], (input_size, hidden_size)),
        "V_h": u(ks[7], (input_size, hidden_size)),
        "U_h": u(ks[8], (hidden_size, hidden_size)),
        "b_r": u(ks[9], (hidden_size,)),
        "b_z": u(ks[10], (hidden_size,)),
        "b_h": u(ks[11], (hidden_size,)),
    }
    fused = {
        "w": jnp.concatenate([raw["W_r"], raw["W_z"], raw["W_h"]], axis=1),   # (I, 3H)
        "v": jnp.concatenate([raw["V_r"], raw["V_z"], raw["V_h"]], axis=1),   # (I, 3H)
        "urz": jnp.concatenate([raw["U_r"], raw["U_z"]], axis=1),             # (H, 2H)
        "uh": raw["U_h"],                                                     # (H, H)
        "b": jnp.concatenate([raw["b_r"], raw["b_z"], raw["b_h"]]
                             ).reshape(1, 3 * hidden_size),                   # (1, 3H)
    }
    return fused, raw


# --------------------------------------------------------------------------------------
# Pure-JAX reference (mirrors the PyTorch forward exactly)
# --------------------------------------------------------------------------------------
def gru_d_reference(h, X_hat, M_obs, gamma_h, raw):
    h = gamma_h * h
    r = jax.nn.sigmoid(X_hat @ raw["W_r"] + h @ raw["U_r"] + M_obs @ raw["V_r"] + raw["b_r"])
    z = jax.nn.sigmoid(X_hat @ raw["W_z"] + h @ raw["U_z"] + M_obs @ raw["V_z"] + raw["b_z"])
    h_tilde = jnp.tanh(X_hat @ raw["W_h"] + (r * h) @ raw["U_h"] + M_obs @ raw["V_h"] + raw["b_h"])
    return (1.0 - z) * h + z * h_tilde


if __name__ == "__main__":
    B, INPUT_SIZE, HIDDEN = 8, 10, 32

    key = jax.random.PRNGKey(0)
    kp, kh, kx, km, kg = jax.random.split(key, 5)

    params, raw = init_params(kp, INPUT_SIZE, HIDDEN)

    h = jax.random.normal(kh, (B, HIDDEN), jnp.float32)
    X_hat = jax.random.normal(kx, (B, INPUT_SIZE), jnp.float32)
    M_obs = (jax.random.uniform(km, (B, INPUT_SIZE)) > 0.4).astype(jnp.float32)
    gamma_h = jnp.exp(-jnp.abs(jax.random.normal(kg, (B, HIDDEN), jnp.float32)))

    ref = jax.block_until_ready(gru_d_reference(h, X_hat, M_obs, gamma_h, raw))

    # f32 MXU path (exact vs. reference)
    fwd = jax.jit(functools.partial(gru_d_cell_forward, params=params))
    out = jax.block_until_ready(fwd(h, X_hat, M_obs, gamma_h))
    np.testing.assert_allclose(np.asarray(out), np.asarray(ref), rtol=1e-5, atol=1e-5)

    # bf16 MXU-operand path (recommended for v6e/v7x; f32 accumulation + elementwise)
    fwd_bf16 = jax.jit(functools.partial(gru_d_cell_forward, params=params,
                                         mxu_dtype=jnp.bfloat16))
    out_bf16 = jax.block_until_ready(fwd_bf16(h, X_hat, M_obs, gamma_h))
    np.testing.assert_allclose(np.asarray(out_bf16), np.asarray(ref), rtol=5e-2, atol=5e-2)

    print("KERNEL_OK")
</pallas_src>

<mosaic_0001>
module attributes {stable_mosaic.version = 11 : i64} {
  func.func @_gru_d_kernel(%arg0: i32, %arg1: memref<8x10xf32, #tpu.memory_space<vmem>>, %arg2: memref<8x10xf32, #tpu.memory_space<vmem>>, %arg3: memref<8x32xf32, #tpu.memory_space<vmem>>, %arg4: memref<8x32xf32, #tpu.memory_space<vmem>>, %arg5: memref<10x96xf32, #tpu.memory_space<vmem>>, %arg6: memref<10x96xf32, #tpu.memory_space<vmem>>, %arg7: memref<32x64xf32, #tpu.memory_space<vmem>>, %arg8: memref<32x32xf32, #tpu.memory_space<vmem>>, %arg9: memref<1x96xf32, #tpu.memory_space<vmem>>, %arg10: memref<8x32xf32, #tpu.memory_space<vmem>>) attributes {dimension_semantics = [#tpu.dimension_semantics<parallel>], iteration_bounds = array<i64: 1>, scalar_prefetch = 0 : i64, scratch_operands = 0 : i64, tpu.core_type = #tpu.core_type<tc>, window_params = [{transform_indices = @transform_0, window_bounds = array<i64: 8, 10>}, {transform_indices = @transform_1, window_bounds = array<i64: 8, 10>}, {transform_indices = @transform_2, window_bounds = array<i64: 8, 32>}, {transform_indices = @transform_3, window_bounds = array<i64: 8, 32>}, {pipeline_mode = #tpu.pipeline_mode<synchronous>, transform_indices = @transform_4, window_bounds = array<i64: 10, 96>}, {pipeline_mode = #tpu.pipeline_mode<synchronous>, transform_indices = @transform_5, window_bounds = array<i64: 10, 96>}, {pipeline_mode = #tpu.pipeline_mode<synchronous>, transform_indices = @transform_6, window_bounds = array<i64: 32, 64>}, {pipeline_mode = #tpu.pipeline_mode<synchronous>, transform_indices = @transform_7, window_bounds = array<i64: 32, 32>}, {pipeline_mode = #tpu.pipeline_mode<synchronous>, transform_indices = @transform_8, window_bounds = array<i64: 1, 96>}, {transform_indices = @transform_9, window_bounds = array<i64: 8, 32>}]} {
    %c0 = arith.constant 0 : index
    %c0_0 = arith.constant 0 : index
    %0 = vector.load %arg4[%c0, %c0_0] : memref<8x32xf32, #tpu.memory_space<vmem>>, vector<8x32xf32>
    %c0_1 = arith.constant 0 : index
    %c0_2 = arith.constant 0 : index
    %1 = vector.load %arg3[%c0_1, %c0_2] : memref<8x32xf32, #tpu.memory_space<vmem>>, vector<8x32xf32>
    %2 = arith.mulf %0, %1 : vector<8x32xf32>
    %c0_3 = arith.constant 0 : index
    %c0_4 = arith.constant 0 : index
    %3 = vector.load %arg1[%c0_3, %c0_4] : memref<8x10xf32, #tpu.memory_space<vmem>>, vector<8x10xf32>
    %c0_5 = arith.constant 0 : index
    %c0_6 = arith.constant 0 : index
    %4 = vector.load %arg5[%c0_5, %c0_6] : memref<10x96xf32, #tpu.memory_space<vmem>>, vector<10x96xf32>
    %cst = arith.constant dense<0.000000e+00> : vector<8x96xf32>
    %5 = tpu.matmul %3, %4, %cst {dimension_numbers = #tpu.dot_dimension_numbers<[1], [0], [0], [1], [0, 0, 1, 1], [], []>} : vector<8x10xf32>, vector<10x96xf32>, vector<8x96xf32> -> vector<8x96xf32>
    %c0_7 = arith.constant 0 : index
    %c0_8 = arith.constant 0 : index
    %6 = vector.load %arg2[%c0_7, %c0_8] : memref<8x10xf32, #tpu.memory_space<vmem>>, vector<8x10xf32>
    %c0_9 = arith.constant 0 : index
    %c0_10 = arith.constant 0 : index
    %7 = vector.load %arg6[%c0_9, %c0_10] : memref<10x96xf32, #tpu.memory_space<vmem>>, vector<10x96xf32>
    %cst_11 = arith.constant dense<0.000000e+00> : vector<8x96xf32>
    %8 = tpu.matmul %6, %7, %cst_11 {dimension_numbers = #tpu.dot_dimension_numbers<[1], [0], [0], [1], [0, 0, 1, 1], [], []>} : vector<8x10xf32>, vector<10x96xf32>, vector<8x96xf32> -> vector<8x96xf32>
    %9 = arith.addf %5, %8 : vector<8x96xf32>
    %c0_12 = arith.constant 0 : index
    %c0_13 = arith.constant 0 : index
    %10 = vector.load %arg9[%c0_12, %c0_13] : memref<1x96xf32, #tpu.memory_space<vmem>>, vector<1x96xf32>
    %11 = vector.broadcast %10 : vector<1x96xf32> to vector<8x96xf32>
    %12 = arith.addf %9, %11 : vector<8x96xf32>
    %c0_14 = arith.constant 0 : index
    %c0_15 = arith.constant 0 : index
    %13 = vector.load %arg7[%c0_14, %c0_15] : memref<32x64xf32, #tpu.memory_space<vmem>>, vector<32x64xf32>
    %cst_16 = arith.constant dense<0.000000e+00> : vector<8x64xf32>
    %14 = tpu.matmul %2, %13, %cst_16 {dimension_numbers = #tpu.dot_dimension_numbers<[1], [0], [0], [1], [0, 0, 1, 1], [], []>} : vector<8x32xf32>, vector<32x64xf32>, vector<8x64xf32> -> vector<8x64xf32>
    %15 = vector.extract_strided_slice %12 {offsets = [0, 0], sizes = [8, 32], strides = [1, 1]} : vector<8x96xf32> to vector<8x32xf32>
    %16 = vector.extract_strided_slice %14 {offsets = [0, 0], sizes = [8, 32], strides = [1, 1]} : vector<8x64xf32> to vector<8x32xf32>
    %17 = arith.addf %15, %16 : vector<8x32xf32>
    %18 = arith.negf %17 : vector<8x32xf32>
    %19 = math.exp %18 : vector<8x32xf32>
    %cst_17 = arith.constant 1.000000e+00 : f32
    %20 = vector.broadcast %cst_17 : f32 to vector<8x32xf32>
    %21 = arith.addf %20, %19 : vector<8x32xf32>
    %22 = arith.divf %20, %21 : vector<8x32xf32>
    %23 = vector.extract_strided_slice %12 {offsets = [0, 32], sizes = [8, 32], strides = [1, 1]} : vector<8x96xf32> to vector<8x32xf32>
    %24 = vector.extract_strided_slice %14 {offsets = [0, 32], sizes = [8, 32], strides = [1, 1]} : vector<8x64xf32> to vector<8x32xf32>
    %25 = arith.addf %23, %24 : vector<8x32xf32>
    %26 = arith.negf %25 : vector<8x32xf32>
    %27 = math.exp %26 : vector<8x32xf32>
    %cst_18 = arith.constant 1.000000e+00 : f32
    %28 = vector.broadcast %cst_18 : f32 to vector<8x32xf32>
    %29 = arith.addf %28, %27 : vector<8x32xf32>
    %30 = arith.divf %28, %29 : vector<8x32xf32>
    %31 = vector.extract_strided_slice %12 {offsets = [0, 64], sizes = [8, 32], strides = [1, 1]} : vector<8x96xf32> to vector<8x32xf32>
    %32 = arith.mulf %22, %2 : vector<8x32xf32>
    %c0_19 = arith.constant 0 : index
    %c0_20 = arith.constant 0 : index
    %33 = vector.load %arg8[%c0_19, %c0_20] : memref<32x32xf32, #tpu.memory_space<vmem>>, vector<32x32xf32>
    %cst_21 = arith.constant dense<0.000000e+00> : vector<8x32xf32>
    %34 = tpu.matmul %32, %33, %cst_21 {dimension_numbers = #tpu.dot_dimension_numbers<[1], [0], [0], [1], [0, 0, 1, 1], [], []>} : vector<8x32xf32>, vector<32x32xf32>, vector<8x32xf32> -> vector<8x32xf32>
    %35 = arith.addf %31, %34 : vector<8x32xf32>
    %36 = math.tanh %35 : vector<8x32xf32>
    %37 = arith.subf %36, %2 : vector<8x32xf32>
    %38 = arith.mulf %30, %37 : vector<8x32xf32>
    %39 = arith.addf %2, %38 : vector<8x32xf32>
    %c0_22 = arith.constant 0 : index
    %c0_23 = arith.constant 0 : index
    %40 = vector.load %arg10[%c0_22, %c0_23] : memref<8x32xf32, #tpu.memory_space<vmem>>, vector<8x32xf32>
    tpu.vector_store %arg10[%c0_22, %c0_23], %39 {strides = array<i32>} : memref<8x32xf32, #tpu.memory_space<vmem>>, vector<8x32xf32>,
    return
  }
  func.func @transform_0(%arg0: i32) -> (i32, i32) {
    %c0_i32 = arith.constant 0 : i32
    %c0_i32_0 = arith.constant 0 : i32
    return %arg0, %c0_i32 : i32, i32
  }
  func.func @transform_1(%arg0: i32) -> (i32, i32) {
    %c0_i32 = arith.constant 0 : i32
    %c0_i32_0 = arith.constant 0 : i32
    return %arg0, %c0_i32 : i32, i32
  }
  func.func @transform_2(%arg0: i32) -> (i32, i32) {
    %c0_i32 = arith.constant 0 : i32
    %c0_i32_0 = arith.constant 0 : i32
    return %arg0, %c0_i32 : i32, i32
  }
  func.func @transform_3(%arg0: i32) -> (i32, i32) {
    %c0_i32 = arith.constant 0 : i32
    %c0_i32_0 = arith.constant 0 : i32
    return %arg0, %c0_i32 : i32, i32
  }
  func.func @transform_4(%arg0: i32) -> (i32, i32) {
    %c0_i32 = arith.constant 0 : i32
    %c0_i32_0 = arith.constant 0 : i32
    %c0_i32_1 = arith.constant 0 : i32
    return %c0_i32, %c0_i32_0 : i32, i32
  }
  func.func @transform_5(%arg0: i32) -> (i32, i32) {
    %c0_i32 = arith.constant 0 : i32
    %c0_i32_0 = arith.constant 0 : i32
    %c0_i32_1 = arith.constant 0 : i32
    return %c0_i32, %c0_i32_0 : i32, i32
  }
  func.func @transform_6(%arg0: i32) -> (i32, i32) {
    %c0_i32 = arith.constant 0 : i32
    %c0_i32_0 = arith.constant 0 : i32
    %c0_i32_1 = arith.constant 0 : i32
    return %c0_i32, %c0_i32_0 : i32, i32
  }
  func.func @transform_7(%arg0: i32) -> (i32, i32) {
    %c0_i32 = arith.constant 0 : i32
    %c0_i32_0 = arith.constant 0 : i32
    %c0_i32_1 = arith.constant 0 : i32
    return %c0_i32, %c0_i32_0 : i32, i32
  }
  func.func @transform_8(%arg0: i32) -> (i32, i32) {
    %c0_i32 = arith.constant 0 : i32
    %c0_i32_0 = arith.constant 0 : i32
    %c0_i32_1 = arith.constant 0 : i32
    return %c0_i32, %c0_i32_0 : i32, i32
  }
  func.func @transform_9(%arg0: i32) -> (i32, i32) {
    %c0_i32 = arith.constant 0 : i32
    %c0_i32_0 = arith.constant 0 : i32
    return %arg0, %c0_i32 : i32, i32
  }
}

</mosaic_0001>

<bundles_post_ra>
// kernel: gru_d_cell_forward.1
= control target key start
LH: loop header
LB: loop body
LE: loop exit
PB: predicated region body
PF: predicated region fallthrough
CT: control target
= control target key end

     0   :  { %14 = vsyncpa [#allocation3], 0  ;;  %s823_s0 = inlined_call_operand.vmem [shape: f32[8,10], index: 0, kind: input, shape index: {}]   ;;  %s824_s1 = inlined_call_operand.hbm [shape: f32[8,10], index: 1, kind: input, shape index: {}]   ;;  %s825_s2 = inlined_call_operand.hbm [shape: f32[8,32], index: 2, kind: input, shape index: {}, may-alias: {2,9}]   ;;  %s826_s3 = inlined_call_operand.hbm [shape: f32[8,32], index: 3, kind: input, shape index: {}]   ;;  %s827_s4 = inlined_call_operand.hbm [shape: f32[10,96], index: 4, kind: input, shape index: {}]   ;;  %s828_s5 = inlined_call_operand.vmem [shape: f32[10,96], index: 5, kind: input, shape index: {}]   ;;  %s829_s6 = inlined_call_operand.hbm [shape: f32[32,64], index: 6, kind: input, shape index: {}]   ;;  %s830_s7 = inlined_call_operand.hbm [shape: f32[32,32], index: 7, kind: input, shape index: {}]   ;;  %s831_s8 = inlined_call_operand.vmem [shape: f32[1,96], index: 8, kind: input, shape index: {}]   ;;  %s832_s9 = inlined_call_operand.hbm [shape: f32[8,32], index: 9, kind: output, shape index: {}, may-alias: {2,9}]  }
   0x1   :  { %15 = vsyncpa [#allocation6], 0 }
   0x2   :  { %16 = vsyncpa [#allocation9], 0 }
   0x3   :  { %17 = vsyncpa [#allocation12], 0 }
   0x4   :  { %18 = vsyncpa [#allocation4], 0  ;;  %s711_s30 = smov [#allocation5]   ;;  %s712_s11 = smov [#allocation8]  }
   0x5   :  { %s37_s10 = sshll.u32 %s711_s30, 4  ;;  %s56_s12 = sshll.u32 %s712_s11, 4  ;;  %s38_s10 = int_to_ptr.vmem [resolvable:$true] %s37_s10  ;;  %s57_s12 = int_to_ptr.vmem [resolvable:$true] %s56_s12 }
   0x6   :  { %s569_s13 = scalar_lea.vmem %s38_s10, 128  ;;  %p574_p1 = scmp.lt.s32.totalorder %s38_s10, %s38_s10 }
   0x7   :  { %p570_p0 = scmp.ne.s32.totalorder %s38_s10, %s569_s13  ;;  %p575_p2 = scmp.lt.s32.totalorder %s569_s13, %s569_s13 }
   0x9   :  { %p576_p3 = por %p575_p2, %p574_p1 }
   0xb   :  { %p577_p4 = pnand %p576_p3, %p570_p0 }
   0xd   :  { %580 = shalt.err (!%p577_p4)
}
   0xe   :  { %40 = dma.hbm_to_vmem [thread:$0]  %s825_s2, 128, %s38_s10, [#allocation6]  }
   0xf   :  { %s589_s16 = scalar_lea.vmem %s57_s12, 256  ;;  %p594_p6 = scmp.lt.s32.totalorder %s57_s12, %s57_s12 }
  0x10   :  { %p590_p5 = scmp.ne.s32.totalorder %s57_s12, %s589_s16  ;;  %p595_p7 = scmp.lt.s32.totalorder %s589_s16, %s589_s16 }
  0x12   :  { %p596_p8 = por %p595_p7, %p594_p6 }
  0x14   :  { %p597_p9 = pnand %p596_p8, %p590_p5 }
  0x16   :  { %600 = shalt.err (!%p597_p9)
}
  0x17   :  { %s713_s17 = smov 128   ;;  %s714_s18 = smov 8  }
  0x18   :  { %62 = dma.hbm_to_vmem [thread:$0]  %s827_s4, 256, %s57_s12, [#allocation9], %s713_s17, %s713_s17, %s714_s18  }
  0x19   :  { %s715_s21 = smov [#allocation2]   ;;  %s716_s23 = smov [#allocation7]  }
  0x1a   :  { %s27_s22 = sshll.u32 %s715_s21, 4  ;;  %s47_s2 = sshll.u32 %s716_s23, 4  ;;  %s28_s22 = int_to_ptr.vmem [resolvable:$true] %s27_s22  ;;  %s48_s2 = int_to_ptr.vmem [resolvable:$true] %s47_s2 }
  0x1b   :  { %s609_s24 = scalar_lea.vmem %s28_s22, 128  ;;  %p614_p11 = scmp.lt.s32.totalorder %s28_s22, %s28_s22 }
  0x1c   :  { %p610_p10 = scmp.ne.s32.totalorder %s28_s22, %s609_s24  ;;  %p615_p12 = scmp.lt.s32.totalorder %s609_s24, %s609_s24 }
  0x1e   :  { %p616_p13 = por %p615_p12, %p614_p11 }
  0x20   :  { %p617_p0 = pnand %p616_p13, %p610_p10 }
  0x22   :  { %620 = shalt.err (!%p617_p0)
}
  0x23   :  { %30 = dma.hbm_to_vmem [thread:$0]  %s824_s1, 128, %s28_s22, [#allocation3]  }
  0x24   :  { %s629_s27 = scalar_lea.vmem %s48_s2, 128  ;;  %p634_p2 = scmp.lt.s32.totalorder %s48_s2, %s48_s2 }
  0x25   :  { %p630_p1 = scmp.ne.s32.totalorder %s48_s2, %s629_s27  ;;  %p635_p3 = scmp.lt.s32.totalorder %s629_s27, %s629_s27 }
  0x27   :  { %p636_p4 = por %p635_p3, %p634_p2 }
  0x29   :  { %p637_p5 = pnand %p636_p4, %p630_p1 }
  0x2b   :  { %640 = shalt.err (!%p637_p5)
}
  0x2c   :  { %50 = dma.hbm_to_vmem [thread:$0]  %s826_s3, 128, %s48_s2, [#allocation6]  }
  0x2d   :  { %s717_s29 = smov [#allocation10]   ;;  %s718_s10 = smov [#allocation11]  }
  0x2e   :  { %s70_s30 = sshll.u32 %s717_s29, 4  ;;  %s82_s11 = sshll.u32 %s718_s10, 4  ;;  %s71_s30 = int_to_ptr.vmem [resolvable:$true] %s70_s30  ;;  %s83_s11 = int_to_ptr.vmem [resolvable:$true] %s82_s11 }
  0x2f   :  { %s649_s12 = scalar_lea.vmem %s71_s30, 512  ;;  %p654_p7 = scmp.lt.s32.totalorder %s71_s30, %s71_s30 }
  0x30   :  { %p650_p6 = scmp.ne.s32.totalorder %s71_s30, %s649_s12  ;;  %p655_p8 = scmp.lt.s32.totalorder %s649_s12, %s649_s12 }
  0x32   :  { %p656_p9 = por %p655_p8, %p654_p7 }
  0x34   :  { %p657_p10 = pnand %p656_p9, %p650_p6 }
  0x36   :  { %660 = shalt.err (!%p657_p10)
}
  0x37   :  { %76 = dma.hbm_to_vmem [thread:$0]  %s829_s6, 512, %s71_s30, [#allocation9], %s713_s17, %s713_s17, %s714_s18  }
  0x38   :  { %s669_s3 = scalar_lea.vmem %s83_s11, 512  ;;  %p674_p12 = scmp.lt.s32.totalorder %s83_s11, %s83_s11 }
  0x39   :  { %p670_p11 = scmp.ne.s32.totalorder %s83_s11, %s669_s3  ;;  %p675_p13 = scmp.lt.s32.totalorder %s669_s3, %s669_s3 }
  0x3b   :  { %p676_p0 = por %p675_p13, %p674_p12 }
  0x3d   :  { %p677_p1 = pnand %p676_p0, %p670_p11 }
  0x3f   :  { %680 = shalt.err (!%p677_p1)
}
  0x40   :  { %88 = dma.hbm_to_vmem [thread:$0]  %s830_s7, 512, %s83_s11, [#allocation12], %s713_s17, %s713_s17, %s714_s18  }
  0x41   :  { %701 = dma.done.wait [#allocation3], 128  }
  0x42   :  { %702 = vsyncadd [#allocation3], 4294967168 }
  0x43   :  { %703 = dma.done.wait [#allocation6], 256  }
  0x44   :  { %704 = vsyncadd [#allocation6], 4294967040 }
  0x45   :  { %705 = dma.done.wait [#allocation9], 768  }
  0x46   :  { %706 = vsyncadd [#allocation9], 4294966528 }
  0x47   :  { %707 = dma.done.wait [#allocation12], 512  }
  0x48   :  { %708 = vsyncadd [#allocation12], 4294966784  ;;  %v719_v0 = vmov 0.0   ;;  %vm720_vm0 = vmmov 0   ;;  %vm122_vm1 = vcmask 1041408   ;;  %v116_v3 = vld [vmem:[%s828_s5] sm:$0xff] }
  0x49   :  { %506 = vmatprep.subr.mxu0 %v719_v0  ;;  %513 = vmatprep.subr.mxu1 %v719_v0  ;;  %v117_v1 = vld [vmem:[%s828_s5 + $0x8] sm:$0x3]  ;;  %v114_v2 = vld [vmem:[#allocation8 + $0x8] sm:$0x3]  ;;  %vm118_vm2 = vcmask 80896   ;;  %v112_v6 = vld [vmem:[%s823_s0] sm:$0xff] }
  0x4a   :  { %510 = vmatprep.mubr.msk.f32.mxu0 %vm720_vm0, %v719_v0  ;;  %517 = vmatprep.mubr.msk.f32.mxu1 %vm720_vm0, %v719_v0  ;;  %v115_v4 = vld [vmem:[#allocation2] sm:$0xff]  ;;  %v113_v5 = vld [vmem:[#allocation8] sm:$0xff]  ;;  %v109_v9 = vld [vmem:[#allocation7] sm:$0xff]  ;;  %vm284_vm3 = vcmask 261120   ;;  %s721_s20 = smov 64   ;;  %s723_s21 = smov [#allocation13]  }
  0x4b   :  { %507 = vmatpush3.msk.msra.mxu0 %vm122_vm1, %v117_v1  ;;  %514 = vmatpush3.msk.msra.mxu1 %vm122_vm1, %v114_v2  ;;  %v283_v7 = vld [vmem:[#allocation10 + $0x18] sm:$0xff]  ;;  %v282_v8 = vld [vmem:[#allocation10 + $0x10] sm:$0xff]  ;;  %v110_v10 = vld [vmem:[#allocation5] sm:$0xff]  ;;  %s470_s22 = sshll.u32 %s723_s21, 4  ;;  %s471_s22 = int_to_ptr.vmem [resolvable:$true] %s470_s22 }
  0x4c   :  { %508 = vmatprep.subr.mxu0 %v719_v0  ;;  %515 = vmatprep.subr.mxu1 %v719_v0  ;;  %v281_v11 = vld [vmem:[#allocation10 + $0x8] sm:$0xff]  ;;  %v280_v12 = vld [vmem:[#allocation10] sm:$0xff]  ;;  %v111_v13 = vmul.f32 %v110_v10, %v109_v9  ;;  %v369_v14 = vld [vmem:[#allocation11 + $0x18] sm:$0xff]  ;;  %s681_s23 = scalar_lea.vmem %s471_s22, 128  ;;  %p686_p3 = scmp.lt.s32.totalorder %s471_s22, %s471_s22 }
  0x4d   :  { %509 = vmatpush3.msra.mxu0 %v116_v3  ;;  %516 = vmatpush3.msra.mxu1 %v113_v5  ;;  %v368_v15 = vld [vmem:[#allocation11 + $0x10] sm:$0xff]  ;;  %v367_v16 = vld [vmem:[#allocation11 + $0x8] sm:$0xff]  ;;  %v366_v17 = vld [vmem:[#allocation11] sm:$0xff]  ;;  %p682_p2 = scmp.ne.s32.totalorder %s471_s22, %s681_s23  ;;  %p687_p4 = scmp.lt.s32.totalorder %s681_s23, %s681_s23 }
  0x4e   :  { %511 = vmatmul.mubr.msk.f32.vlgmr.msra.gmra.mxu0 %vm118_vm2, %v115_v4  ;;  %520 = vmatprep.subr.mxu0 %v719_v0  ;;  %v486_v23 = vld [vmem:[%s831_s8] ss:$0 sm:$0xff]  ;;  %s722_s8 = smov 96  }
  0x4f   :  { %518 = vmatmul.mubr.msk.f32.vlgmr.msra.gmra.mxu1 %vm118_vm2, %v112_v6  ;;  %521 = vmatpush3.msra.mxu0 %v283_v7  ;;  %p688_p5 = por %p687_p4, %p686_p3 }
  0x50   :  { %522 = vmatprep.subr.mxu0 %v719_v0  ;;  %528 = vmatprep.mubr.msk.f32.mxu0 %vm720_vm0, %v719_v0 }
  0x51   :  { %523 = vmatpush3.msra.mxu0 %v282_v8  ;;  %531 = vmatprep.subr.mxu1 %v719_v0  ;;  %p689_p6 = pnand %p688_p5, %p682_p2 }
  0x52   :  { %524 = vmatprep.subr.mxu0 %v719_v0  ;;  %539 = vmatprep.mubr.msk.f32.mxu1 %vm720_vm0, %v719_v0 }
  0x53   :  { %525 = vmatpush3.msra.mxu0 %v281_v11  ;;  %532 = vmatpush3.msra.mxu1 %v369_v14 }
  0x54   :  { %526 = vmatprep.subr.mxu0 %v719_v0  ;;  %533 = vmatprep.subr.mxu1 %v719_v0 }
  0x55   :  { %527 = vmatpush3.msra.mxu0 %v280_v12  ;;  %534 = vmatpush3.msra.mxu1 %v368_v15 }
  0x56   :  { %529 = vmatmul.mubr.msk.f32.vlgmr.msra.gmra.mxu0 %vm284_vm3, %v111_v13  ;;  %535 = vmatprep.subr.mxu1 %v719_v0 }
  0x57   :  { %536 = vmatpush3.msra.mxu1 %v367_v16 }
  0x58   :  { %537 = vmatprep.subr.mxu1 %v719_v0 }
  0x59   :  { %538 = vmatpush3.msra.mxu1 %v366_v17 }
 0x10e   :  { %v192_v18 = vpop.f32.mrf.mxu0 }
 0x10f   :  { %v268_v19 = vpop.f32.mrf.mxu1 }
 0x110   :  { %v512_v20 = vpop.f32.mrf.mxu0  ;;  %v269_v21 = vadd.f32 %v268_v19, %v192_v18 }
 0x111   :  { %v519_v22 = vpop.f32.mrf.mxu1 }
 0x112   :  { %v279_v24 = vadd.f32 %v486_v23, %v269_v21 }
 0x116   :  { %v354_v25 = vpop.f32.mrf.mxu0 }
 0x117   :  { %v358_v26 = vadd.f32 %v354_v25, %v279_v24 }
 0x118   :  { %v530_v27 = vpop.f32.mrf.mxu0 }
 0x119   :  { %v488_v28 = vmul.f32 -1.442695, %v358_v26 }
 0x11b   :  { %555 = vpow2.f32 %v488_v28 }
 0x128   :  { %v556_v29 = vpop.eup %555 }
 0x129   :  { %v362_v30 = vadd.f32 1.0, %v556_v29 }
 0x12b   :  { %557 = vrcp.f32 %v362_v30 }
 0x138   :  { %v558_v31 = vpop.eup %557 }
 0x139   :  { %v365_v32 = vmul.f32 %v558_v31, %v111_v13 }
 0x13b   :  { %540 = vmatmul.mubr.msk.f32.vlgmr.msra.gmra.mxu1 %vm284_vm3, %v365_v32 }
 0x1fb   :  { %v439_v33 = vpop.f32.mrf.mxu1 }
 0x1fc   :  { %444 = vrot.lane.b32.xlu0 %v439_v33, %s721_s20 }
 0x1fd   :  { %v541_v34 = vpop.f32.mrf.mxu1 }
 0x200   :  { %449 = vrot.lane.b32.xlu0 %v111_v13, %s721_s20 }
 0x26e   :  { %v445_v35 = vpop.permute.xlu0 %444 }
 0x26f   :  { %v447_v36 = vadd.f32 %v445_v35, %v279_v24 }
 0x271   :  { %559 = vtanh.f32 %v447_v36 }
 0x272   :  { %v450_v37 = vpop.permute.xlu0 %449 }
 0x27e   :  { %v560_v38 = vpop.eup %559 }
 0x27f   :  { %v452_v39 = vsub.f32 %v560_v38, %v450_v37 }
 0x281   :  { %454 = vrot.lane.b32.xlu1 %v452_v39, %s722_s8 }
 0x2f3   :  { %v455_v40 = vpop.permute.xlu1 %454 }
 0x2f4   :  { %v457_v41 = vmul.f32 %v558_v31, %v455_v40 }
 0x2f6   :  { %459 = vrot.lane.b32.xlu1 %v457_v41, %s722_s8 }
 0x368   :  { %v460_v42 = vpop.permute.xlu1 %459 }
 0x369   :  { %v462_v43 = vadd.f32 %v460_v42, %v111_v13 }
 0x36b   :  { %463 = vst.msk [vmem:[#allocation13] sm:$0xff] %vm284_vm3, %v462_v43 }
 0x36c   :  { %692 = shalt.err (!%p689_p6)
}
 0x36d   :  { %473 = dma.vmem_to_hbm [thread:$0]  %s471_s22, 128, %s832_s9, [#allocation4]  }
 0x36e   :  { %709 = dma.done.wait [#allocation4], 128  }
 0x36f   :  { %710 = vsyncadd [#allocation4], 4294967168 }
 0x370   :  { %477 = vsyncpa [#allocation3], 1 }
 0x371   :  { %478 = vsyncpa [#allocation6], 1 }
 0x372   :  { %479 = vsyncpa [#allocation9], 1 }
 0x373   :  { %480 = vsyncpa [#allocation12], 1 }
 0x374   :  { %481 = vsyncpa [#allocation4], 1 }

</bundles_post_ra>
